<compile_context>
chip_gen: v7x
topology: tpu7x:2x2x1
jax: 0.10.0
libtpu: 0.0.40
codegen_flags: <defaults>
</compile_context>

<pallas_src>
import functools

import jax
import jax.numpy as jnp
from jax import lax
from jax.experimental import pallas as pl
from jax.experimental.pallas import tpu as pltpu

EPS = 1e-5


def _resblock_kernel(x_ref, w1_ref, w2_ref, out_ref, *, H, W, compute_dtype):
    # x_ref:  (1, C, H*W) f32          out_ref: (1, C, H*W)
    # w*_ref: (3, C, 3*C) compute_dtype   (kernel row dy -> taps dx=0..2 on K)
    C = x_ref.shape[1]
    HW = H * W

    # Reflect-pad boundary masks: built once at (1, HW) (broadcast along
    # sublanes is free) and shared by both convs.
    lane = lax.broadcasted_iota(jnp.int32, (1, HW), 1)
    col = lane % W
    row0 = lane < W                    # output row y == 0
    rowL = lane >= (H - 1) * W         # output row y == H-1
    col0 = col == 0                    # output col x == 0
    colL = col == (W - 1)              # output col x == W-1

    def shift_rows(a):
        # (sample y-1, sample y, sample y+1) with reflect boundary.
        up = pltpu.roll(a, W, 1)          # up[i] = a[i - W]
        dn = pltpu.roll(a, HW - W, 1)     # dn[i] = a[i + W]
        return (jnp.where(row0, dn, up), a, jnp.where(rowL, up, dn))

    def shift_cols(a):
        # (sample x-1, sample x, sample x+1) with reflect boundary.
        lf = pltpu.roll(a, 1, 1)          # lf[i] = a[i - 1]
        rt = pltpu.roll(a, HW - 1, 1)     # rt[i] = a[i + 1]
        return (jnp.where(col0, rt, lf), a, jnp.where(colL, lf, rt))

    def conv3x3_instnorm(a, w_ref):
        # conv3x3(reflect-pad(a)) -- bias dropped (cancelled by IN) -- then
        # InstanceNorm over HW with biased variance, f32 statistics.
        a = a.astype(compute_dtype)           # cast ONCE; shifts run narrow
        rows = shift_rows(a)
        acc = jnp.zeros((C, HW), jnp.float32)
        for dy in range(3):                   # 3 matmuls, K = 3*C each
            lf, ct, rt = shift_cols(rows[dy])
            taps = jnp.concatenate([lf, ct, rt], axis=0)          # (3C, HW)
            acc += jnp.dot(w_ref[dy], taps,
                           preferred_element_type=jnp.float32)
        inv_hw = 1.0 / HW                     # trace-time constant
        mean = jnp.sum(acc, axis=1, keepdims=True) * inv_hw
        ex2 = jnp.sum(acc * acc, axis=1, keepdims=True) * inv_hw
        var = ex2 - mean * mean
        return (acc - mean) * lax.rsqrt(var + EPS)    # rsqrt -> EUP slot

    h = jnp.maximum(conv3x3_instnorm(x_ref[0], w1_ref), 0.0)      # ReLU (f32)
    y = conv3x3_instnorm(h, w2_ref)
    out_ref[0] = (x_ref[0] + y).astype(out_ref.dtype)             # residual


def _prep_weights(w, compute_dtype):
    # (O, I, Kh, Kw) -> (Kh, O, Kw, I) -> (3, O, 3*I): the three column taps
    # of kernel row dy are laid out contiguously along the contraction dim so
    # each conv is 3 MXU matmuls with K = 3*C, matching the stacked taps.
    C = w.shape[0]
    return jnp.transpose(w, (2, 0, 3, 1)).reshape(3, C, 3 * C).astype(compute_dtype)


def residual_block_pallas(x, w1, b1, w2, b2, *, compute_dtype=jnp.bfloat16):
    """x: (N, C, H, W) f32; w*: (C, C, 3, 3); b*: (C,). Returns (N, C, H, W).

    b1/b2 are accepted for parity with nn.Conv2d(bias=True) but are unused:
    a per-channel bias is exactly cancelled by the affine=False InstanceNorm
    that immediately follows each conv.
    """
    del b1, b2
    N, C, H, W = x.shape
    HW = H * W
    w1_t = _prep_weights(w1, compute_dtype)
    w2_t = _prep_weights(w2, compute_dtype)
    x_flat = x.reshape(N, C, HW)               # lane-dense spatial axis

    kernel = functools.partial(_resblock_kernel, H=H, W=W,
                               compute_dtype=compute_dtype)

    # Explicit VMEM budget: double-buffered f32 in/out blocks + two weight
    # tensors (double-buffered) + in-kernel temps (acc/h f32, narrow shifts).
    itemsize = jnp.dtype(compute_dtype).itemsize
    est = (4 * C * HW * 4                        # 2x double-buffered in + out
           + 2 * 2 * 9 * C * C * itemsize        # two weight tensors
           + (3 * 4 + 8 * itemsize) * C * HW)    # acc/h f32 + narrow shift temps
    vmem_limit = int(min(100 * 2**20, max(32 * 2**20, 2 * est)))

    cost = pl.CostEstimate(
        flops=2 * 2 * 9 * C * C * HW * N,        # 2 convs x 9 taps x C*C*HW MACs
        transcendentals=2 * C * N,               # one rsqrt per channel per IN
        bytes_accessed=2 * C * HW * 4 * N + 2 * 9 * C * C * itemsize)

    wspec = pl.BlockSpec((3, C, 3 * C), lambda n: (0, 0, 0))
    out = pl.pallas_call(
        kernel,
        out_shape=jax.ShapeDtypeStruct((N, C, HW), x.dtype),
        grid=(N,),
        in_specs=[pl.BlockSpec((1, C, HW), lambda n: (n, 0, 0)), wspec, wspec],
        out_specs=pl.BlockSpec((1, C, HW), lambda n: (n, 0, 0)),
        compiler_params=pltpu.CompilerParams(
            dimension_semantics=("parallel",),   # samples shard across TCs
            vmem_limit_bytes=vmem_limit),
        cost_estimate=cost,
    )(x_flat, w1_t, w2_t)
    return out.reshape(N, C, H, W)


# ---------------- pure-JAX reference for verification ----------------
def _reference(x, w1, b1, w2, b2):
    def conv(h, w, b):
        hp = jnp.pad(h, ((0, 0), (0, 0), (1, 1), (1, 1)), mode="reflect")
        y = lax.conv_general_dilated(hp, w, (1, 1), "VALID",
                                     dimension_numbers=("NCHW", "OIHW", "NCHW"))
        return y + b[None, :, None, None]

    def inorm(y):
        m = y.mean(axis=(2, 3), keepdims=True)
        v = ((y - m) ** 2).mean(axis=(2, 3), keepdims=True)
        return (y - m) / jnp.sqrt(v + EPS)

    h = jnp.maximum(inorm(conv(x, w1, b1)), 0.0)
    h = inorm(conv(h, w2, b2))
    return x + h


if __name__ == "__main__":
    key = jax.random.PRNGKey(0)
    k1, k2, k3, k4, k5 = jax.random.split(key, 5)
    N, C, H, W = 2, 4, 16, 16

    x = jax.random.normal(k1, (N, C, H, W), jnp.float32)
    w1 = jax.random.normal(k2, (C, C, 3, 3), jnp.float32) * 0.1
    b1 = jax.random.normal(k3, (C,), jnp.float32) * 0.1
    w2 = jax.random.normal(k4, (C, C, 3, 3), jnp.float32) * 0.1
    b2 = jax.random.normal(k5, (C,), jnp.float32) * 0.1

    ref = _reference(x, w1, b1, w2, b2)

    # f32 MXU path: strict check of the math (reflect pad, tap order + fused-K
    # layout, bias cancellation, biased IN variance, residual add).
    out_f32 = jax.jit(functools.partial(
        residual_block_pallas, compute_dtype=jnp.float32))(x, w1, b1, w2, b2)
    jax.block_until_ready(out_f32)
    assert out_f32.shape == (N, C, H, W)
    assert jnp.allclose(out_f32, ref, atol=1e-4, rtol=1e-4), (
        f"f32 max abs err {jnp.max(jnp.abs(out_f32 - ref))}")

    # bf16 MXU path (default / fast): loose tolerance; exact math checked above.
    out_bf16 = jax.jit(residual_block_pallas)(x, w1, b1, w2, b2)
    jax.block_until_ready(out_bf16)
    assert out_bf16.shape == (N, C, H, W)
    assert jnp.allclose(out_bf16, ref, atol=1e-1, rtol=1e-1), (
        f"bf16 max abs err {jnp.max(jnp.abs(out_bf16 - ref))}")

    print("KERNEL_OK")
</pallas_src>

<mosaic_0001>
module attributes {stable_mosaic.version = 11 : i64} {
  func.func @_resblock_kernel(%arg0: i32, %arg1: memref<1x4x256xf32, #tpu.memory_space<vmem>>, %arg2: memref<3x4x12xf32, #tpu.memory_space<vmem>>, %arg3: memref<3x4x12xf32, #tpu.memory_space<vmem>>, %arg4: memref<1x4x256xf32, #tpu.memory_space<vmem>>) attributes {dimension_semantics = [#tpu.dimension_semantics<parallel>], iteration_bounds = array<i64: 2>, scalar_prefetch = 0 : i64, scratch_operands = 0 : i64, tpu.core_type = #tpu.core_type<tc>, window_params = [{transform_indices = @transform_0, window_bounds = array<i64: 1, 4, 256>}, {pipeline_mode = #tpu.pipeline_mode<synchronous>, transform_indices = @transform_1, window_bounds = array<i64: 3, 4, 12>}, {pipeline_mode = #tpu.pipeline_mode<synchronous>, transform_indices = @transform_2, window_bounds = array<i64: 3, 4, 12>}, {transform_indices = @transform_3, window_bounds = array<i64: 1, 4, 256>}]} {
    %0 = tpu.iota {dimensions = array<i32: 1>} : vector<1x256xi32>
    %c16_i32 = arith.constant 16 : i32
    %c0_i32 = arith.constant 0 : i32
    %1 = arith.cmpi eq, %c16_i32, %c0_i32 : i32
    %c1_i32 = arith.constant 1 : i32
    %2 = arith.select %1, %c1_i32, %c16_i32 : i32
    %3 = vector.broadcast %2 : i32 to vector<1x256xi32>
    %4 = arith.remsi %0, %3 : vector<1x256xi32>
    %c0_i32_0 = arith.constant 0 : i32
    %5 = vector.broadcast %c0_i32_0 : i32 to vector<1x256xi32>
    %6 = arith.cmpi ne, %4, %5 : vector<1x256xi32>
    %c0_i32_1 = arith.constant 0 : i32
    %7 = vector.broadcast %c0_i32_1 : i32 to vector<1x256xi32>
    %8 = arith.cmpi slt, %4, %7 : vector<1x256xi32>
    %c0_i32_2 = arith.constant 0 : i32
    %9 = arith.cmpi slt, %2, %c0_i32_2 : i32
    %10 = vector.broadcast %9 : i1 to vector<1x256xi1>
    %11 = vector.broadcast %10 : vector<1x256xi1> to vector<1x256xi1>
    %12 = arith.xori %8, %11 : vector<1x256xi1>
    %13 = arith.andi %12, %6 : vector<1x256xi1>
    %14 = vector.broadcast %2 : i32 to vector<1x256xi32>
    %15 = arith.addi %4, %14 : vector<1x256xi32>
    %16 = arith.select %13, %15, %4 : vector<1x256xi1>, vector<1x256xi32>
    %c16_i32_3 = arith.constant 16 : i32
    %17 = vector.broadcast %c16_i32_3 : i32 to vector<1x256xi32>
    %18 = arith.cmpi slt, %0, %17 : vector<1x256xi32>
    %c240_i32 = arith.constant 240 : i32
    %19 = vector.broadcast %c240_i32 : i32 to vector<1x256xi32>
    %20 = arith.cmpi sge, %0, %19 : vector<1x256xi32>
    %c0_i32_4 = arith.constant 0 : i32
    %21 = vector.broadcast %c0_i32_4 : i32 to vector<1x256xi32>
    %22 = arith.cmpi eq, %16, %21 : vector<1x256xi32>
    %c15_i32 = arith.constant 15 : i32
    %23 = vector.broadcast %c15_i32 : i32 to vector<1x256xi32>
    %24 = arith.cmpi eq, %16, %23 : vector<1x256xi32>
    %c0 = arith.constant 0 : index
    %c0_5 = arith.constant 0 : index
    %c0_6 = arith.constant 0 : index
    %25 = vector.load %arg1[%c0, %c0_5, %c0_6] : memref<1x4x256xf32, #tpu.memory_space<vmem>>, vector<1x4x256xf32>
    %26 = vector.shape_cast %25 : vector<1x4x256xf32> to vector<4x256xf32>
    %c16_i32_7 = arith.constant 16 : i32
    %27 = tpu.dynamic_rotate %26 by %c16_i32_7 dim 1 : vector<4x256xf32>, i32 -> vector<4x256xf32>
    %c240_i32_8 = arith.constant 240 : i32
    %28 = tpu.dynamic_rotate %26 by %c240_i32_8 dim 1 : vector<4x256xf32>, i32 -> vector<4x256xf32>
    %29 = vector.shape_cast %18 : vector<1x256xi1> to vector<1x256xi1>
    %30 = vector.broadcast %29 : vector<1x256xi1> to vector<4x256xi1>
    %31 = arith.select %30, %28, %27 : vector<4x256xi1>, vector<4x256xf32>
    %32 = vector.shape_cast %20 : vector<1x256xi1> to vector<1x256xi1>
    %33 = vector.broadcast %32 : vector<1x256xi1> to vector<4x256xi1>
    %34 = arith.select %33, %27, %28 : vector<4x256xi1>, vector<4x256xf32>
    %cst = arith.constant 0.000000e+00 : f32
    %35 = vector.broadcast %cst : f32 to vector<4x256xf32>
    %c1_i32_9 = arith.constant 1 : i32
    %36 = tpu.dynamic_rotate %31 by %c1_i32_9 dim 1 : vector<4x256xf32>, i32 -> vector<4x256xf32>
    %c255_i32 = arith.constant 255 : i32
    %37 = tpu.dynamic_rotate %31 by %c255_i32 dim 1 : vector<4x256xf32>, i32 -> vector<4x256xf32>
    %38 = vector.shape_cast %22 : vector<1x256xi1> to vector<1x256xi1>
    %39 = vector.broadcast %38 : vector<1x256xi1> to vector<4x256xi1>
    %40 = arith.select %39, %37, %36 : vector<4x256xi1>, vector<4x256xf32>
    %41 = vector.shape_cast %24 : vector<1x256xi1> to vector<1x256xi1>
    %42 = vector.broadcast %41 : vector<1x256xi1> to vector<4x256xi1>
    %43 = arith.select %42, %36, %37 : vector<4x256xi1>, vector<4x256xf32>
    %44 = tpu.concatenate %40, %31, %43 in 0 : vector<4x256xf32>, vector<4x256xf32>, vector<4x256xf32> -> vector<12x256xf32>
    %c0_10 = arith.constant 0 : index
    %c0_11 = arith.constant 0 : index
    %c0_12 = arith.constant 0 : index
    %45 = vector.load %arg2[%c0_10, %c0_11, %c0_12] : memref<3x4x12xf32, #tpu.memory_space<vmem>>, vector<1x4x12xf32>
    %46 = vector.shape_cast %45 : vector<1x4x12xf32> to vector<4x12xf32>
    %cst_13 = arith.constant dense<0.000000e+00> : vector<4x256xf32>
    %47 = tpu.matmul %46, %44, %cst_13 {dimension_numbers = #tpu.dot_dimension_numbers<[1], [0], [0], [1], [0, 0, 1, 1], [], []>} : vector<4x12xf32>, vector<12x256xf32>, vector<4x256xf32> -> vector<4x256xf32>
    %48 = arith.addf %35, %47 : vector<4x256xf32>
    %c1_i32_14 = arith.constant 1 : i32
    %49 = tpu.dynamic_rotate %26 by %c1_i32_14 dim 1 : vector<4x256xf32>, i32 -> vector<4x256xf32>
    %c255_i32_15 = arith.constant 255 : i32
    %50 = tpu.dynamic_rotate %26 by %c255_i32_15 dim 1 : vector<4x256xf32>, i32 -> vector<4x256xf32>
    %51 = vector.shape_cast %22 : vector<1x256xi1> to vector<1x256xi1>
    %52 = vector.broadcast %51 : vector<1x256xi1> to vector<4x256xi1>
    %53 = arith.select %52, %50, %49 : vector<4x256xi1>, vector<4x256xf32>
    %54 = vector.shape_cast %24 : vector<1x256xi1> to vector<1x256xi1>
    %55 = vector.broadcast %54 : vector<1x256xi1> to vector<4x256xi1>
    %56 = arith.select %55, %49, %50 : vector<4x256xi1>, vector<4x256xf32>
    %57 = tpu.concatenate %53, %26, %56 in 0 : vector<4x256xf32>, vector<4x256xf32>, vector<4x256xf32> -> vector<12x256xf32>
    %c1 = arith.constant 1 : index
    %c0_16 = arith.constant 0 : index
    %c0_17 = arith.constant 0 : index
    %58 = vector.load %arg2[%c1, %c0_16, %c0_17] : memref<3x4x12xf32, #tpu.memory_space<vmem>>, vector<1x4x12xf32>
    %59 = vector.shape_cast %58 : vector<1x4x12xf32> to vector<4x12xf32>
    %cst_18 = arith.constant dense<0.000000e+00> : vector<4x256xf32>
    %60 = tpu.matmul %59, %57, %cst_18 {dimension_numbers = #tpu.dot_dimension_numbers<[1], [0], [0], [1], [0, 0, 1, 1], [], []>} : vector<4x12xf32>, vector<12x256xf32>, vector<4x256xf32> -> vector<4x256xf32>
    %61 = arith.addf %48, %60 : vector<4x256xf32>
    %c1_i32_19 = arith.constant 1 : i32
    %62 = tpu.dynamic_rotate %34 by %c1_i32_19 dim 1 : vector<4x256xf32>, i32 -> vector<4x256xf32>
    %c255_i32_20 = arith.constant 255 : i32
    %63 = tpu.dynamic_rotate %34 by %c255_i32_20 dim 1 : vector<4x256xf32>, i32 -> vector<4x256xf32>
    %64 = vector.shape_cast %22 : vector<1x256xi1> to vector<1x256xi1>
    %65 = vector.broadcast %64 : vector<1x256xi1> to vector<4x256xi1>
    %66 = arith.select %65, %63, %62 : vector<4x256xi1>, vector<4x256xf32>
    %67 = vector.shape_cast %24 : vector<1x256xi1> to vector<1x256xi1>
    %68 = vector.broadcast %67 : vector<1x256xi1> to vector<4x256xi1>
    %69 = arith.select %68, %62, %63 : vector<4x256xi1>, vector<4x256xf32>
    %70 = tpu.concatenate %66, %34, %69 in 0 : vector<4x256xf32>, vector<4x256xf32>, vector<4x256xf32> -> vector<12x256xf32>
    %c2 = arith.constant 2 : index
    %c0_21 = arith.constant 0 : index
    %c0_22 = arith.constant 0 : index
    %71 = vector.load %arg2[%c2, %c0_21, %c0_22] : memref<3x4x12xf32, #tpu.memory_space<vmem>>, vector<1x4x12xf32>
    %72 = vector.shape_cast %71 : vector<1x4x12xf32> to vector<4x12xf32>
    %cst_23 = arith.constant dense<0.000000e+00> : vector<4x256xf32>
    %73 = tpu.matmul %72, %70, %cst_23 {dimension_numbers = #tpu.dot_dimension_numbers<[1], [0], [0], [1], [0, 0, 1, 1], [], []>} : vector<4x12xf32>, vector<12x256xf32>, vector<4x256xf32> -> vector<4x256xf32>
    %74 = arith.addf %61, %73 : vector<4x256xf32>
    %cst_24 = arith.constant dense<0.000000e+00> : vector<4xf32>
    %75 = vector.multi_reduction <add>, %74, %cst_24 [1] : vector<4x256xf32> to vector<4xf32>
    %76 = vector.shape_cast %75 : vector<4xf32> to vector<4x1xf32>
    %cst_25 = arith.constant 3.906250e-03 : f32
    %77 = vector.broadcast %cst_25 : f32 to vector<4x1xf32>
    %78 = arith.mulf %76, %77 : vector<4x1xf32>
    %79 = arith.mulf %74, %74 : vector<4x256xf32>
    %cst_26 = arith.constant dense<0.000000e+00> : vector<4xf32>
    %80 = vector.multi_reduction <add>, %79, %cst_26 [1] : vector<4x256xf32> to vector<4xf32>
    %81 = vector.shape_cast %80 : vector<4xf32> to vector<4x1xf32>
    %cst_27 = arith.constant 3.906250e-03 : f32
    %82 = vector.broadcast %cst_27 : f32 to vector<4x1xf32>
    %83 = arith.mulf %81, %82 : vector<4x1xf32>
    %84 = arith.mulf %78, %78 : vector<4x1xf32>
    %85 = arith.subf %83, %84 : vector<4x1xf32>
    %86 = vector.broadcast %78 : vector<4x1xf32> to vector<4x256xf32>
    %87 = arith.subf %74, %86 : vector<4x256xf32>
    %cst_28 = arith.constant 9.99999974E-6 : f32
    %88 = vector.broadcast %cst_28 : f32 to vector<4x1xf32>
    %89 = arith.addf %85, %88 : vector<4x1xf32>
    %90 = math.rsqrt %89 : vector<4x1xf32>
    %91 = vector.broadcast %90 : vector<4x1xf32> to vector<4x256xf32>
    %92 = arith.mulf %87, %91 : vector<4x256xf32>
    %cst_29 = arith.constant 0.000000e+00 : f32
    %93 = vector.broadcast %cst_29 : f32 to vector<4x256xf32>
    %94 = arith.maximumf %92, %93 : vector<4x256xf32>
    %c16_i32_30 = arith.constant 16 : i32
    %95 = tpu.dynamic_rotate %94 by %c16_i32_30 dim 1 : vector<4x256xf32>, i32 -> vector<4x256xf32>
    %c240_i32_31 = arith.constant 240 : i32
    %96 = tpu.dynamic_rotate %94 by %c240_i32_31 dim 1 : vector<4x256xf32>, i32 -> vector<4x256xf32>
    %97 = vector.shape_cast %18 : vector<1x256xi1> to vector<1x256xi1>
    %98 = vector.broadcast %97 : vector<1x256xi1> to vector<4x256xi1>
    %99 = arith.select %98, %96, %95 : vector<4x256xi1>, vector<4x256xf32>
    %100 = vector.shape_cast %20 : vector<1x256xi1> to vector<1x256xi1>
    %101 = vector.broadcast %100 : vector<1x256xi1> to vector<4x256xi1>
    %102 = arith.select %101, %95, %96 : vector<4x256xi1>, vector<4x256xf32>
    %cst_32 = arith.constant 0.000000e+00 : f32
    %103 = vector.broadcast %cst_32 : f32 to vector<4x256xf32>
    %c1_i32_33 = arith.constant 1 : i32
    %104 = tpu.dynamic_rotate %99 by %c1_i32_33 dim 1 : vector<4x256xf32>, i32 -> vector<4x256xf32>
    %c255_i32_34 = arith.constant 255 : i32
    %105 = tpu.dynamic_rotate %99 by %c255_i32_34 dim 1 : vector<4x256xf32>, i32 -> vector<4x256xf32>
    %106 = vector.shape_cast %22 : vector<1x256xi1> to vector<1x256xi1>
    %107 = vector.broadcast %106 : vector<1x256xi1> to vector<4x256xi1>
    %108 = arith.select %107, %105, %104 : vector<4x256xi1>, vector<4x256xf32>
    %109 = vector.shape_cast %24 : vector<1x256xi1> to vector<1x256xi1>
    %110 = vector.broadcast %109 : vector<1x256xi1> to vector<4x256xi1>
    %111 = arith.select %110, %104, %105 : vector<4x256xi1>, vector<4x256xf32>
    %112 = tpu.concatenate %108, %99, %111 in 0 : vector<4x256xf32>, vector<4x256xf32>, vector<4x256xf32> -> vector<12x256xf32>
    %c0_35 = arith.constant 0 : index
    %c0_36 = arith.constant 0 : index
    %c0_37 = arith.constant 0 : index
    %113 = vector.load %arg3[%c0_35, %c0_36, %c0_37] : memref<3x4x12xf32, #tpu.memory_space<vmem>>, vector<1x4x12xf32>
    %114 = vector.shape_cast %113 : vector<1x4x12xf32> to vector<4x12xf32>
    %cst_38 = arith.constant dense<0.000000e+00> : vector<4x256xf32>
    %115 = tpu.matmul %114, %112, %cst_38 {dimension_numbers = #tpu.dot_dimension_numbers<[1], [0], [0], [1], [0, 0, 1, 1], [], []>} : vector<4x12xf32>, vector<12x256xf32>, vector<4x256xf32> -> vector<4x256xf32>
    %116 = arith.addf %103, %115 : vector<4x256xf32>
    %c1_i32_39 = arith.constant 1 : i32
    %117 = tpu.dynamic_rotate %94 by %c1_i32_39 dim 1 : vector<4x256xf32>, i32 -> vector<4x256xf32>
    %c255_i32_40 = arith.constant 255 : i32
    %118 = tpu.dynamic_rotate %94 by %c255_i32_40 dim 1 : vector<4x256xf32>, i32 -> vector<4x256xf32>
    %119 = vector.shape_cast %22 : vector<1x256xi1> to vector<1x256xi1>
    %120 = vector.broadcast %119 : vector<1x256xi1> to vector<4x256xi1>
    %121 = arith.select %120, %118, %117 : vector<4x256xi1>, vector<4x256xf32>
    %122 = vector.shape_cast %24 : vector<1x256xi1> to vector<1x256xi1>
    %123 = vector.broadcast %122 : vector<1x256xi1> to vector<4x256xi1>
    %124 = arith.select %123, %117, %118 : vector<4x256xi1>, vector<4x256xf32>
    %125 = tpu.concatenate %121, %94, %124 in 0 : vector<4x256xf32>, vector<4x256xf32>, vector<4x256xf32> -> vector<12x256xf32>
    %c1_41 = arith.constant 1 : index
    %c0_42 = arith.constant 0 : index
    %c0_43 = arith.constant 0 : index
    %126 = vector.load %arg3[%c1_41, %c0_42, %c0_43] : memref<3x4x12xf32, #tpu.memory_space<vmem>>, vector<1x4x12xf32>
    %127 = vector.shape_cast %126 : vector<1x4x12xf32> to vector<4x12xf32>
    %cst_44 = arith.constant dense<0.000000e+00> : vector<4x256xf32>
    %128 = tpu.matmul %127, %125, %cst_44 {dimension_numbers = #tpu.dot_dimension_numbers<[1], [0], [0], [1], [0, 0, 1, 1], [], []>} : vector<4x12xf32>, vector<12x256xf32>, vector<4x256xf32> -> vector<4x256xf32>
    %129 = arith.addf %116, %128 : vector<4x256xf32>
    %c1_i32_45 = arith.constant 1 : i32
    %130 = tpu.dynamic_rotate %102 by %c1_i32_45 dim 1 : vector<4x256xf32>, i32 -> vector<4x256xf32>
    %c255_i32_46 = arith.constant 255 : i32
    %131 = tpu.dynamic_rotate %102 by %c255_i32_46 dim 1 : vector<4x256xf32>, i32 -> vector<4x256xf32>
    %132 = vector.shape_cast %22 : vector<1x256xi1> to vector<1x256xi1>
    %133 = vector.broadcast %132 : vector<1x256xi1> to vector<4x256xi1>
    %134 = arith.select %133, %131, %130 : vector<4x256xi1>, vector<4x256xf32>
    %135 = vector.shape_cast %24 : vector<1x256xi1> to vector<1x256xi1>
    %136 = vector.broadcast %135 : vector<1x256xi1> to vector<4x256xi1>
    %137 = arith.select %136, %130, %131 : vector<4x256xi1>, vector<4x256xf32>
    %138 = tpu.concatenate %134, %102, %137 in 0 : vector<4x256xf32>, vector<4x256xf32>, vector<4x256xf32> -> vector<12x256xf32>
    %c2_47 = arith.constant 2 : index
    %c0_48 = arith.constant 0 : index
    %c0_49 = arith.constant 0 : index
    %139 = vector.load %arg3[%c2_47, %c0_48, %c0_49] : memref<3x4x12xf32, #tpu.memory_space<vmem>>, vector<1x4x12xf32>
    %140 = vector.shape_cast %139 : vector<1x4x12xf32> to vector<4x12xf32>
    %cst_50 = arith.constant dense<0.000000e+00> : vector<4x256xf32>
    %141 = tpu.matmul %140, %138, %cst_50 {dimension_numbers = #tpu.dot_dimension_numbers<[1], [0], [0], [1], [0, 0, 1, 1], [], []>} : vector<4x12xf32>, vector<12x256xf32>, vector<4x256xf32> -> vector<4x256xf32>
    %142 = arith.addf %129, %141 : vector<4x256xf32>
    %cst_51 = arith.constant dense<0.000000e+00> : vector<4xf32>
    %143 = vector.multi_reduction <add>, %142, %cst_51 [1] : vector<4x256xf32> to vector<4xf32>
    %144 = vector.shape_cast %143 : vector<4xf32> to vector<4x1xf32>
    %cst_52 = arith.constant 3.906250e-03 : f32
    %145 = vector.broadcast %cst_52 : f32 to vector<4x1xf32>
    %146 = arith.mulf %144, %145 : vector<4x1xf32>
    %147 = arith.mulf %142, %142 : vector<4x256xf32>
    %cst_53 = arith.constant dense<0.000000e+00> : vector<4xf32>
    %148 = vector.multi_reduction <add>, %147, %cst_53 [1] : vector<4x256xf32> to vector<4xf32>
    %149 = vector.shape_cast %148 : vector<4xf32> to vector<4x1xf32>
    %cst_54 = arith.constant 3.906250e-03 : f32
    %150 = vector.broadcast %cst_54 : f32 to vector<4x1xf32>
    %151 = arith.mulf %149, %150 : vector<4x1xf32>
    %152 = arith.mulf %146, %146 : vector<4x1xf32>
    %153 = arith.subf %151, %152 : vector<4x1xf32>
    %154 = vector.broadcast %146 : vector<4x1xf32> to vector<4x256xf32>
    %155 = arith.subf %142, %154 : vector<4x256xf32>
    %cst_55 = arith.constant 9.99999974E-6 : f32
    %156 = vector.broadcast %cst_55 : f32 to vector<4x1xf32>
    %157 = arith.addf %153, %156 : vector<4x1xf32>
    %158 = math.rsqrt %157 : vector<4x1xf32>
    %159 = vector.broadcast %158 : vector<4x1xf32> to vector<4x256xf32>
    %160 = arith.mulf %155, %159 : vector<4x256xf32>
    %c0_56 = arith.constant 0 : index
    %c0_57 = arith.constant 0 : index
    %c0_58 = arith.constant 0 : index
    %161 = vector.load %arg1[%c0_56, %c0_57, %c0_58] : memref<1x4x256xf32, #tpu.memory_space<vmem>>, vector<1x4x256xf32>
    %162 = vector.shape_cast %161 : vector<1x4x256xf32> to vector<4x256xf32>
    %163 = arith.addf %162, %160 : vector<4x256xf32>
    %c0_59 = arith.constant 0 : index
    %c0_60 = arith.constant 0 : index
    %c0_61 = arith.constant 0 : index
    %164 = vector.load %arg4[%c0_59, %c0_60, %c0_61] : memref<1x4x256xf32, #tpu.memory_space<vmem>>, vector<1x4x256xf32>
    %165 = vector.shape_cast %164 : vector<1x4x256xf32> to vector<4x256xf32>
    %166 = vector.shape_cast %163 : vector<4x256xf32> to vector<1x4x256xf32>
    tpu.vector_store %arg4[%c0_59, %c0_60, %c0_61], %166 {strides = array<i32>} : memref<1x4x256xf32, #tpu.memory_space<vmem>>, vector<1x4x256xf32>,
    return
  }
  func.func @transform_0(%arg0: i32) -> (i32, i32, i32) {
    %c0_i32 = arith.constant 0 : i32
    %c0_i32_0 = arith.constant 0 : i32
    %c0_i32_1 = arith.constant 0 : i32
    return %arg0, %c0_i32, %c0_i32_0 : i32, i32, i32
  }
  func.func @transform_1(%arg0: i32) -> (i32, i32, i32) {
    %c0_i32 = arith.constant 0 : i32
    %c0_i32_0 = arith.constant 0 : i32
    %c0_i32_1 = arith.constant 0 : i32
    %c0_i32_2 = arith.constant 0 : i32
    return %c0_i32, %c0_i32_0, %c0_i32_1 : i32, i32, i32
  }
  func.func @transform_2(%arg0: i32) -> (i32, i32, i32) {
    %c0_i32 = arith.constant 0 : i32
    %c0_i32_0 = arith.constant 0 : i32
    %c0_i32_1 = arith.constant 0 : i32
    %c0_i32_2 = arith.constant 0 : i32
    return %c0_i32, %c0_i32_0, %c0_i32_1 : i32, i32, i32
  }
  func.func @transform_3(%arg0: i32) -> (i32, i32, i32) {
    %c0_i32 = arith.constant 0 : i32
    %c0_i32_0 = arith.constant 0 : i32
    %c0_i32_1 = arith.constant 0 : i32
    return %arg0, %c0_i32, %c0_i32_0 : i32, i32, i32
  }
}

</mosaic_0001>

<bundles_post_ra>
// kernel: residual_block_pallas.1
= control target key start
LH: loop header
LB: loop body
LE: loop exit
PB: predicated region body
PF: predicated region fallthrough
CT: control target
= control target key end

     0   :  { %s1217_s12 = smov 0   ;;  %s1511_s0 = inlined_call_operand.vmem [shape: f32[2,4,256], index: 0, kind: input, shape index: {}]   ;;  %s1512_s1 = inlined_call_operand.vmem [shape: f32[3,4,12], index: 1, kind: input, shape index: {}]   ;;  %s1513_s2 = inlined_call_operand.vmem [shape: f32[3,4,12], index: 2, kind: input, shape index: {}]   ;;  %s1514_s3 = inlined_call_operand.vmem [shape: f32[2,4,256], index: 3, kind: output, shape index: {}]  }
   0x1 LB: > { %s1004_s13 = sadd.s32 4294967295, %s1189_s12   ;;  %p1008_p0 = scmp.ge.s32.totalorder %s1189_s12, 1  ;;  %s1189_s12 = sphi %s1217_s12, %s13_s12  }
   0x2   : > { %p137_p1 = scmp.lt.s32.totalorder %s1189_s12, 3 }
   0x4   : > { %p138_p2 = pnand %p1008_p0, %p137_p1 }
   0x5   : > { %p161_p3 = scmp.lt.s32.totalorder (!%p138_p2), %s1004_s13, 1  ;;  %s1191_s18 = smov (!%p138_p2), 16   ;;  %v171_v3 = vlaneseq (!%p138_p2)  ;;  %v1195_v11 = vmov (!%p138_p2), 0.0   ;;  %vm267_vm7 = vcmask (!%p138_p2), 1043456   ;;  %vm1196_vm10 = vmmov (!%p138_p2), 1  }
   0x6   : > { %141 = sbr.rel (%p138_p2) target bundleno = 1305 (0x519), region = 32  ;;  %s1192_s19 = smov (!%p138_p2), 1   ;;  %367 = vmatprep.mubr.f32.mxu0 (!%p138_p2), %v1195_v11  ;;  %726 = vmatprep.mubr.f32.mxu1 (!%p138_p2), %v1195_v11  ;;  %vm1306_vm11 = vmpackc.low (!%p138_p2), %vm267_vm7, %vm1196_vm10  ;;  %v1013_v47 = vld [vmem:[%s1512_s1 + $0x4] sm:$0xf] (!%p138_p2)  ;;  %vm293_vm12 = vcmask (!%p138_p2), 97280  }
   0x7   : > { %s1193_s20 = smov (!%p138_p2), 112   ;;  %s1194_s21 = smov (!%p138_p2), 127   ;;  %v1242_v4 = vand.u32 (!%p138_p2), 127, %v171_v3  ;;  %v1031_v18 = vld [vmem:[%s1513_s2 + $0x8] sm:$0xf] (!%p138_p2) }
   0x9   : > { %v1245_v5 = vadd.s32 (!%p138_p2), 128, %v1242_v4  ;;  %vm239_vm0 = vcmp.lt.s32.totalorder (!%p138_p2), %v1242_v4, 1  ;;  %vm198_vm1 = vcmp.lt.s32.totalorder (!%p138_p2), %v1242_v4, 16  ;;  %v178_v14 = vand.u32 (!%p138_p2), 15, %v1242_v4 }
   0xa   : > { %vm220_vm2 = vcmp.lt.s32.totalorder (!%p138_p2), %v1242_v4, 112  ;;  %vm246_vm4 = vcmp.lt.s32.totalorder (!%p138_p2), %v1242_v4, 127  ;;  %v626_v4 = vld [vmem:[%s1513_s2] sm:$0xf] (!%p138_p2) }
   0xb   : > { %v185_v6 = vand.u32 (!%p138_p2), 15, %v1245_v5  ;;  %vm201_vm3 = vcmp.ge.s32.totalorder (!%p138_p2), %v1245_v5, 240  ;;  %vm1268_vm8 = vcmp.eq.s32.totalorder (!%p138_p2), %v178_v14, 0  ;;  %vm1272_vm9 = vcmp.eq.s32.totalorder (!%p138_p2), %v178_v14, 15 }
   0xd   : > { %s1526_s13 = smov (!%p161_p3, %s1004_s13), 1  ;;  %vm1256_vm5 = vcmp.eq.s32.totalorder %v185_v6, 0  ;;  %vm1260_vm6 = vcmp.eq.s32.totalorder %v185_v6, 15 }
   0xe   : > { %s1037_s14 = sshll.u32 %s1526_s13, 3 }
   0xf   : > { %s165_s17 = scalar_lea.vmem %s1511_s0, %s1037_s14  ;;  %s170_s9 = scalar_lea.vmem %s1514_s3, %s1037_s14 }
  0x10   : > { %v1233_v0 = vld [vmem:[%s165_s17] sm:$0xff] }
  0x11   : > { %v208_v1 = vcombine.high %v1233_v0, %v1233_v0  ;;  %v287_v27 = vcombine.low %v1233_v0, %v1233_v0 }
  0x13   : > { %v1097_v2 = vpack.i.bf16 %v208_v1, %v1233_v0 }
  0x15   : > { %1098 = vrot.lane.b32.xlu0 %v1097_v2, %s1191_s18  ;;  %1108 = vrot.lane.b32.xlu1 %v1097_v2, %s1192_s19 }
  0x19   : > { %1103 = vrot.lane.b32.xlu0 %v1097_v2, %s1193_s20  ;;  %1113 = vrot.lane.b32.xlu1 %v1097_v2, %s1194_s21 }
  0x87   : > { %v1099_v7 = vpop.permute.xlu0 %1098  ;;  %v1109_v8 = vpop.permute.xlu1 %1108 }
  0x88   : > { %v1111_v9 = vunpack.i.h.bf16 %v1109_v8  ;;  %v1110_v10 = vunpack.i.l.bf16 %v1109_v8  ;;  %v1101_v12 = vunpack.i.h.bf16 %v1099_v7  ;;  %v1100_v13 = vunpack.i.l.bf16 %v1099_v7 }
  0x8a   : > { %v275_v19 = vsel %vm239_vm0, %v1110_v10, %v1111_v9  ;;  %v214_v24 = vsel %vm198_vm1, %v1100_v13, %v1101_v12  ;;  %v215_v28 = vsel %vm198_vm1, %v1101_v12, %v1100_v13  ;;  %v276_v33 = vsel %vm239_vm0, %v1111_v9, %v1110_v10 }
  0x8b   : > { %v1104_v16 = vpop.permute.xlu0 %1103  ;;  %v1114_v17 = vpop.permute.xlu1 %1113  ;;  %v264_v54 = vrot.slane %v214_v24, 4 }
  0x8c   : > { %v1106_v20 = vunpack.i.h.bf16 %v1104_v16  ;;  %v1105_v21 = vunpack.i.l.bf16 %v1104_v16  ;;  %v1116_v22 = vunpack.i.h.bf16 %v1114_v17  ;;  %v1115_v23 = vunpack.i.l.bf16 %v1114_v17 }
  0x8e   : > { %v1282_v29 = vsel %vm220_vm2, %v1105_v21, %v1106_v20  ;;  %v222_v30 = vsel %vm220_vm2, %v1106_v20, %v1105_v21  ;;  %v282_v31 = vsel %vm246_vm4, %v1116_v22, %v1115_v23  ;;  %v281_v34 = vsel %vm246_vm4, %v1115_v23, %v1116_v22 }
  0x8f   : > { %v227_v32 = vsel %vm198_vm1, %v1282_v29, %v215_v28  ;;  %v284_v35 = vsel %vm1256_vm5, %v282_v31, %v275_v19  ;;  %v1299_v37 = vsel %vm201_vm3, %v214_v24, %v222_v30  ;;  %v286_v38 = vsel %vm1260_vm6, %v275_v19, %v282_v31 }
  0x90   : > { %v1122_v36 = vpack.i.bf16 %v214_v24, %v227_v32  ;;  %v290_v39 = vsel %vm267_vm7, %v284_v35, %v1233_v0  ;;  %v283_v42 = vsel %vm1268_vm8, %v281_v34, %v276_v33  ;;  %v285_v43 = vsel %vm1272_vm9, %v276_v33, %v281_v34  ;;  %v1020_v33 = vld [vmem:[%s1512_s1 + $0x8] sm:$0xf] }
  0x91   : > { %v1039_v41 = vpack.c.bf16 %v286_v38, %v290_v39  ;;  %v289_v44 = vsel %vm267_vm7, %v283_v42, %v287_v27  ;;  %v1132_v45 = vpack.i.bf16 %v1299_v37, %v1282_v29  ;;  %v263_v55 = vrot.slane %v227_v32, 4 }
  0x92   : > { %1123 = vrot.lane.b32.xlu1 %v1122_v36, %s1194_s21  ;;  %1118 = vrot.lane.b32.xlu0 %v1122_v36, %s1192_s19  ;;  %v1042_v46 = vpack.c.bf16 %v285_v43, %v289_v44  ;;  %v472_v17 = vrot.slane %v1282_v29, 4  ;;  %v473_v19 = vrot.slane %v1299_v37, 4  ;;  %v270_v29 = vld [vmem:[%s1512_s1] sm:$0xf] }
  0x93   : > { %1041 = vmatprep.subr.msk.bf16.mxu0 %vm1306_vm11, %v1039_v41 }
  0x94   : > { %1044 = vmatpush1.bf16.msk.msra.mxu0 %vm1306_vm11, %v1042_v46 }
  0x96   : > { %1133 = vrot.lane.b32.xlu1 %v1132_v45, %s1194_s21  ;;  %1128 = vrot.lane.b32.xlu0 %v1132_v45, %s1192_s19 }
  0x97   : > { %1016 = vmatmul.mubr.msk.f32.vlgmr.msra.gmra.mrb[0].mxu0 %vm293_vm12, %v1013_v47 }
  0x98   : > { %447 = vmatprep.mubr.f32.mxu0 %v1195_v11 }
 0x104   : > { %v1124_v48 = vpop.permute.xlu1 %1123  ;;  %v1119_v49 = vpop.permute.xlu0 %1118 }
 0x105   : > { %v1126_v50 = vunpack.i.h.bf16 %v1124_v48  ;;  %v1125_v51 = vunpack.i.l.bf16 %v1124_v48  ;;  %v1121_v52 = vunpack.i.h.bf16 %v1119_v49  ;;  %v1120_v53 = vunpack.i.l.bf16 %v1119_v49 }
 0x107   : > { %v247_v56 = vsel %vm246_vm4, %v1125_v51, %v1126_v50  ;;  %v248_v57 = vsel %vm246_vm4, %v1126_v50, %v1125_v51  ;;  %v240_v58 = vsel %vm239_vm0, %v1120_v53, %v1121_v52  ;;  %v241_v59 = vsel %vm239_vm0, %v1121_v52, %v1120_v53 }
 0x108   : > { %v253_v60 = vsel %vm1268_vm8, %v247_v56, %v241_v59  ;;  %v254_v61 = vsel %vm1256_vm5, %v248_v57, %v240_v58  ;;  %v259_v62 = vsel %vm1272_vm9, %v241_v59, %v247_v56  ;;  %v1134_v63 = vpop.permute.xlu1 %1133  ;;  %v1129_v1 = vpop.permute.xlu0 %1128  ;;  %v260_v2 = vsel %vm1260_vm6, %v240_v58, %v248_v57 }
 0x109   : > { %v268_v3 = vsel %vm267_vm7, %v253_v60, %v263_v55  ;;  %v1136_v6 = vunpack.i.h.bf16 %v1134_v63  ;;  %v1135_v7 = vunpack.i.l.bf16 %v1134_v63  ;;  %v1131_v8 = vunpack.i.h.bf16 %v1129_v1 }
 0x10a   : > { %v1048_v9 = vpack.c.bf16 %v259_v62, %v268_v3  ;;  %v1130_v10 = vunpack.i.l.bf16 %v1129_v1  ;;  %v269_v12 = vsel %vm267_vm7, %v254_v61, %v264_v54 }
 0x10b   : > { %v464_v13 = vsel %vm246_vm4, %v1135_v7, %v1136_v6  ;;  %v465_v14 = vsel %vm246_vm4, %v1136_v6, %v1135_v7  ;;  %v1045_v16 = vpack.c.bf16 %v260_v2, %v269_v12 }
 0x10c   : > { %v458_v20 = vsel %vm239_vm0, %v1130_v10, %v1131_v8  ;;  %v459_v21 = vsel %vm239_vm0, %v1131_v8, %v1130_v10 }
 0x10d   : > { %v466_v22 = vsel %vm1268_vm8, %v464_v13, %v459_v21  ;;  %v467_v23 = vsel %vm1256_vm5, %v465_v14, %v458_v20  ;;  %v468_v24 = vsel %vm1272_vm9, %v459_v21, %v464_v13  ;;  %1047 = vmatprep.subr.msk.bf16.mxu0 %vm1306_vm11, %v1045_v16  ;;  %v469_v27 = vsel %vm1260_vm6, %v458_v20, %v465_v14 }
 0x10e   : > { %v476_v28 = vsel %vm267_vm7, %v466_v22, %v472_v17  ;;  %1050 = vmatpush1.bf16.msk.msra.mxu0 %vm1306_vm11, %v1048_v9  ;;  %v477_v30 = vsel %vm267_vm7, %v467_v23, %v473_v19 }
 0x10f   : > { %v1054_v31 = vpack.c.bf16 %v468_v24, %v476_v28  ;;  %v1051_v32 = vpack.c.bf16 %v469_v27, %v477_v30 }
 0x111   : > { %1019 = vmatmul.mubr.msk.f32.vlgmr.msra.gmra.mrb[0].mxu0 %vm293_vm12, %v270_v29  ;;  %1053 = vmatprep.subr.msk.bf16.mxu0 %vm1306_vm11, %v1051_v32 }
 0x112   : > { %1056 = vmatpush1.bf16.msk.msra.mxu0 %vm1306_vm11, %v1054_v31  ;;  %553 = vmatprep.mubr.f32.mxu0 %v1195_v11 }
 0x119   : > { %1023 = vmatmul.mubr.msk.f32.vlgmr.msra.gmra.mrb[0].mxu0 %vm293_vm12, %v1020_v33 }
 0x1ec   : > { %v555_v34 = vpop.f32.mrb[0].mxu0 }
 0x1ed   : > { %v568_v35 = vmul.f32 %v555_v34, %v555_v34  ;;  %v557_v36 = vpop.f32.mrb[1].mxu0  ;;  %v562_v37 = vsel %vm267_vm7, %v555_v34, 0.0 }
 0x1ee   : > { %v563_v38 = vsel %vm267_vm7, %v557_v36, 0.0  ;;  %v569_v39 = vmul.f32 %v557_v36, %v557_v36 }
 0x1ef   : > { %v564_v41 = vadd.f32 %v563_v38, %v562_v37  ;;  %v570_v42 = vsel %vm267_vm7, %v568_v35, 0.0  ;;  %v1024_v37 = vld [vmem:[%s1513_s2 + $0x4] sm:$0xf] }
 0x1f0   : > { %v571_v43 = vsel %vm267_vm7, %v569_v39, 0.0 }
 0x1f1   : > { %565 = vadd.xlane.f32.xlu0 %v564_v41  ;;  %v572_v44 = vadd.f32 %v571_v43, %v570_v42 }
 0x1f3   : > { %573 = vadd.xlane.f32.xlu1 %v572_v44 }
 0x27e   : > { %v566_v45 = vpop.xlane.xlu0 %565 }
 0x27f   : > { %v567_v46 = vmul.f32 0.00390625, %v566_v45 }
 0x280   : > { %v574_v47 = vpop.xlane.xlu1 %573 }
 0x281   : > { %v575_v48 = vmul.f32 0.00390625, %v574_v47  ;;  %v576_v49 = vmul.f32 %v567_v46, %v567_v46  ;;  %v578_v52 = vsub.f32 %v555_v34, %v567_v46  ;;  %v579_v53 = vsub.f32 %v557_v36, %v567_v46 }
 0x283   : > { %v577_v50 = vsub.f32 %v575_v48, %v576_v49 }
 0x285   : > { %v580_v51 = vadd.f32 1e-05, %v577_v50 }
 0x287   : > { %1179 = vrsqrt.f32 %v580_v51 }
 0x291   : > { %v1180_v54 = vpop.eup %1179 }
 0x292   : > { %v582_v55 = vmul.f32 %v1180_v54, %v578_v52  ;;  %v583_v56 = vmul.f32 %v1180_v54, %v579_v53 }
 0x294   : > { %v584_v57 = vmax.f32 %v582_v55, 0.0  ;;  %v585_v58 = vmax.f32 %v583_v56, 0.0 }
 0x296   : > { %v1142_v59 = vpack.i.bf16 %v585_v58, %v584_v57  ;;  %v645_v23 = vrot.slane %v584_v57, 4  ;;  %v646_v28 = vrot.slane %v585_v58, 4 }
 0x298   : > { %1143 = vrot.lane.b32.xlu1 %v1142_v59, %s1193_s20  ;;  %1138 = vrot.lane.b32.xlu0 %v1142_v59, %s1191_s18 }
 0x29c   : > { %1153 = vrot.lane.b32.xlu1 %v1142_v59, %s1194_s21  ;;  %1148 = vrot.lane.b32.xlu0 %v1142_v59, %s1192_s19 }
 0x30a   : > { %v1144_v60 = vpop.permute.xlu1 %1143  ;;  %v1139_v61 = vpop.permute.xlu0 %1138 }
 0x30b   : > { %v1146_v62 = vunpack.i.h.bf16 %v1144_v60  ;;  %v1145_v63 = vunpack.i.l.bf16 %v1144_v60  ;;  %v1141_v1 = vunpack.i.h.bf16 %v1139_v61  ;;  %v1140_v2 = vunpack.i.l.bf16 %v1139_v61 }
 0x30d   : > { %v1395_v3 = vsel %vm220_vm2, %v1145_v63, %v1146_v62  ;;  %v590_v6 = vsel %vm198_vm1, %v1140_v2, %v1141_v1  ;;  %v591_v7 = vsel %vm198_vm1, %v1141_v1, %v1140_v2  ;;  %v597_v8 = vsel %vm220_vm2, %v1146_v62, %v1145_v63 }
 0x30e   : > { %v1154_v9 = vpop.permute.xlu1 %1153  ;;  %v1149_v10 = vpop.permute.xlu0 %1148  ;;  %v598_v12 = vsel %vm198_vm1, %v1395_v3, %v591_v7  ;;  %v1412_v22 = vsel %vm201_vm3, %v590_v6, %v597_v8  ;;  %v621_v45 = vrot.slane %v590_v6, 4  ;;  %v831_v7 = vrot.slane %v1395_v3, 4 }
 0x30f   : > { %v1156_v13 = vunpack.i.h.bf16 %v1154_v9  ;;  %v1155_v14 = vunpack.i.l.bf16 %v1154_v9  ;;  %v1151_v16 = vunpack.i.h.bf16 %v1149_v10  ;;  %v1150_v17 = vunpack.i.l.bf16 %v1149_v10 }
 0x310   : > { %v1162_v19 = vpack.i.bf16 %v590_v6, %v598_v12  ;;  %v1172_v33 = vpack.i.bf16 %v1412_v22, %v1395_v3  ;;  %v620_v46 = vrot.slane %v598_v12, 4  ;;  %v832_v8 = vrot.slane %v1412_v22, 4 }
 0x311   : > { %v637_v20 = vsel %vm246_vm4, %v1155_v14, %v1156_v13  ;;  %v632_v21 = vsel %vm239_vm0, %v1151_v16, %v1150_v17  ;;  %v631_v24 = vsel %vm239_vm0, %v1150_v17, %v1151_v16  ;;  %v638_v27 = vsel %vm246_vm4, %v1156_v13, %v1155_v14 }
 0x312   : > { %1163 = vrot.lane.b32.xlu1 %v1162_v19, %s1194_s21  ;;  %1158 = vrot.lane.b32.xlu0 %v1162_v19, %s1192_s19  ;;  %v639_v29 = vsel %vm1268_vm8, %v637_v20, %v632_v21  ;;  %v640_v5 = vsel %vm1256_vm5, %v638_v27, %v631_v24  ;;  %v642_v30 = vsel %vm1260_vm6, %v631_v24, %v638_v27 }
 0x313   : > { %v641_v31 = vsel %vm1272_vm9, %v632_v21, %v637_v20  ;;  %v649_v32 = vsel %vm267_vm7, %v639_v29, %v645_v23  ;;  %v650_v34 = vsel %vm267_vm7, %v640_v5, %v646_v28 }
 0x314   : > { %v1060_v35 = vpack.c.bf16 %v641_v31, %v649_v32  ;;  %v1057_v36 = vpack.c.bf16 %v642_v30, %v650_v34 }
 0x316   : > { %1173 = vrot.lane.b32.xlu1 %v1172_v33, %s1194_s21  ;;  %1168 = vrot.lane.b32.xlu0 %v1172_v33, %s1192_s19 }
 0x317   : > { %1059 = vmatprep.subr.msk.bf16.mxu1 %vm1306_vm11, %v1057_v36 }
 0x318   : > { %1062 = vmatpush1.bf16.msk.msra.mxu1 %vm1306_vm11, %v1060_v35 }
 0x31b   : > { %1027 = vmatmul.mubr.msk.f32.vlgmr.msra.gmra.mrb[0].mxu1 %vm293_vm12, %v1024_v37 }
 0x31c   : > { %806 = vmatprep.mubr.f32.mxu1 %v1195_v11 }
 0x384   : > { %v1164_v38 = vpop.permute.xlu1 %1163  ;;  %v1159_v39 = vpop.permute.xlu0 %1158 }
 0x385   : > { %v1166_v41 = vunpack.i.h.bf16 %v1164_v38  ;;  %v1165_v42 = vunpack.i.l.bf16 %v1164_v38  ;;  %v1161_v43 = vunpack.i.h.bf16 %v1159_v39  ;;  %v1160_v44 = vunpack.i.l.bf16 %v1159_v39 }
 0x387   : > { %v612_v47 = vsel %vm246_vm4, %v1165_v42, %v1166_v41  ;;  %v613_v48 = vsel %vm246_vm4, %v1166_v41, %v1165_v42  ;;  %v606_v49 = vsel %vm239_vm0, %v1160_v44, %v1161_v43  ;;  %v607_v50 = vsel %vm239_vm0, %v1161_v43, %v1160_v44 }
 0x388   : > { %v614_v51 = vsel %vm1268_vm8, %v612_v47, %v607_v50  ;;  %v615_v52 = vsel %vm1256_vm5, %v613_v48, %v606_v49  ;;  %v616_v53 = vsel %vm1272_vm9, %v607_v50, %v612_v47  ;;  %v1174_v54 = vpop.permute.xlu1 %1173  ;;  %v1169_v55 = vpop.permute.xlu0 %1168  ;;  %v617_v56 = vsel %vm1260_vm6, %v606_v49, %v613_v48 }
 0x389   : > { %v624_v57 = vsel %vm267_vm7, %v614_v51, %v620_v46  ;;  %v1176_v58 = vunpack.i.h.bf16 %v1174_v54  ;;  %v1175_v59 = vunpack.i.l.bf16 %v1174_v54  ;;  %v1171_v60 = vunpack.i.h.bf16 %v1169_v55 }
 0x38a   : > { %v1066_v61 = vpack.c.bf16 %v616_v53, %v624_v57  ;;  %v1170_v62 = vunpack.i.l.bf16 %v1169_v55  ;;  %v625_v63 = vsel %vm267_vm7, %v615_v52, %v621_v45 }
 0x38b   : > { %v823_v1 = vsel %vm246_vm4, %v1175_v59, %v1176_v58  ;;  %v824_v2 = vsel %vm246_vm4, %v1176_v58, %v1175_v59  ;;  %v1063_v6 = vpack.c.bf16 %v617_v56, %v625_v63 }
 0x38c   : > { %v817_v9 = vsel %vm239_vm0, %v1170_v62, %v1171_v60  ;;  %v818_v10 = vsel %vm239_vm0, %v1171_v60, %v1170_v62 }
 0x38d   : > { %v825_v12 = vsel %vm1268_vm8, %v823_v1, %v818_v10  ;;  %v826_v13 = vsel %vm1256_vm5, %v824_v2, %v817_v9  ;;  %v827_v14 = vsel %vm1272_vm9, %v818_v10, %v823_v1  ;;  %1065 = vmatprep.subr.msk.bf16.mxu1 %vm1306_vm11, %v1063_v6  ;;  %v828_v3 = vsel %vm1260_vm6, %v817_v9, %v824_v2 }
 0x38e   : > { %v835_v16 = vsel %vm267_vm7, %v825_v12, %v831_v7  ;;  %1068 = vmatpush1.bf16.msk.msra.mxu1 %vm1306_vm11, %v1066_v61  ;;  %v836_v15 = vsel %vm267_vm7, %v826_v13, %v832_v8 }
 0x38f   : > { %v1072_v25 = vpack.c.bf16 %v827_v14, %v835_v16  ;;  %v1069_v26 = vpack.c.bf16 %v828_v3, %v836_v15 }
 0x391   : > { %1030 = vmatmul.mubr.msk.f32.vlgmr.msra.gmra.mrb[0].mxu1 %vm293_vm12, %v626_v4  ;;  %1071 = vmatprep.subr.msk.bf16.mxu1 %vm1306_vm11, %v1069_v26 }
 0x392   : > { %1074 = vmatpush1.bf16.msk.msra.mxu1 %vm1306_vm11, %v1072_v25  ;;  %912 = vmatprep.mubr.f32.mxu1 %v1195_v11 }
 0x399   : > { %1034 = vmatmul.mubr.msk.f32.vlgmr.msra.gmra.mrb[0].mxu1 %vm293_vm12, %v1031_v18 }
 0x46c   : > { %v914_v17 = vpop.f32.mrb[0].mxu1 }
 0x46d   : > { %v927_v19 = vmul.f32 %v914_v17, %v914_v17  ;;  %v916_v20 = vpop.f32.mrb[1].mxu1  ;;  %v921_v21 = vsel %vm267_vm7, %v914_v17, 0.0 }
 0x46e   : > { %v922_v22 = vsel %vm267_vm7, %v916_v20, 0.0  ;;  %v928_v23 = vmul.f32 %v916_v20, %v916_v20 }
 0x46f   : > { %v923_v24 = vadd.f32 %v922_v22, %v921_v21  ;;  %v929_v40 = vsel %vm267_vm7, %v927_v19, 0.0 }
 0x470   : > { %v930_v27 = vsel %vm267_vm7, %v928_v23, 0.0 }
 0x471   : > { %924 = vadd.xlane.f32.xlu0 %v923_v24  ;;  %v931_v11 = vadd.f32 %v930_v27, %v929_v40 }
 0x473   : > { %932 = vadd.xlane.f32.xlu1 %v931_v11 }
 0x4fe   : > { %v925_v28 = vpop.xlane.xlu0 %924 }
 0x4ff   : > { %v926_v29 = vmul.f32 0.00390625, %v925_v28 }
 0x500   : > { %v933_v5 = vpop.xlane.xlu1 %932 }
 0x501   : > { %v934_v30 = vmul.f32 0.00390625, %v933_v5  ;;  %v935_v31 = vmul.f32 %v926_v29, %v926_v29  ;;  %v937_v34 = vsub.f32 %v914_v17, %v926_v29  ;;  %v938_v35 = vsub.f32 %v916_v20, %v926_v29 }
 0x503   : > { %v936_v32 = vsub.f32 %v934_v30, %v935_v31 }
 0x505   : > { %v939_v33 = vadd.f32 1e-05, %v936_v32 }
 0x507   : > { %1181 = vrsqrt.f32 %v939_v33 }
 0x511   : > { %v1182_v36 = vpop.eup %1181 }
 0x512   : > { %v941_v37 = vmul.f32 %v1182_v36, %v937_v34  ;;  %v942_v38 = vmul.f32 %v1182_v36, %v938_v35 }
 0x514   : > { %v945_v39 = vcombine.low %v941_v37, %v942_v38 }
 0x516   : > { %v947_v41 = vadd.f32 %v945_v39, %v1233_v0 }
 0x518   : > { %948 = vst [vmem:[%s170_s9] sm:$0xff] %v947_v41 }
 0x519 PF: > { %s13_s12 = sadd.s32 1, %s1189_s12  }
 0x51a   : > { %p10_p4 = scmp.ge.s32.totalorder %s13_s12, 4  }
 0x51c   :  { %12 = sbr.rel (!%p10_p4) target bundleno = 1 (0x1), region = 66 }

</bundles_post_ra>
